<compile_context>
chip_gen: v5e
topology: v5e:2x2
jax: 0.10.0
libtpu: 0.0.40
codegen_flags: <defaults>
</compile_context>

<pallas_src>
import jax
import jax.numpy as jnp
from jax.experimental import pallas as pl
from jax.experimental.pallas import tpu as pltpu


def _round_up(x, m):
    return ((x + m - 1) // m) * m


def mlp_kernel(x_ref, w1_ref, w2_ref, w3_ref, b1_ref, b2_ref, b3_ref, o_ref):
    w1 = w1_ref[...]            # (in_f, h1p)   e.g. (4, 8)
    w2 = w2_ref[...]            # (h1p, h2p)    e.g. (8, 16)
    w3 = w3_ref[...]            # (h2p, out)    e.g. (16, 3)
    cdt = w1.dtype              # compute dtype (bf16 by default, f32 optional)

    # Cast x to the MXU compute dtype in-register (no wrapper pass over x).
    x = x_ref[...].astype(cdt)  # (tile_n, in_f)

    # Layer 1: f32 accumulation on the MXU; bias add / ReLU in f32 (v5e-safe).
    h = jnp.dot(x, w1, preferred_element_type=jnp.float32)
    h = jnp.maximum(h + b1_ref[...].astype(jnp.float32), 0.0)
    # Layer 2
    h = jnp.dot(h.astype(cdt), w2, preferred_element_type=jnp.float32)
    h = jnp.maximum(h + b2_ref[...].astype(jnp.float32), 0.0)
    # Layer 3 (output lane width = out_dim; stored narrow, no wide slab)
    h = jnp.dot(h.astype(cdt), w3, preferred_element_type=jnp.float32)
    h = jnp.maximum(h + b3_ref[...].astype(jnp.float32), 0.0)

    o_ref[...] = h.astype(o_ref.dtype)


def pack_params(params, compute_dtype=jnp.bfloat16):
    """One-time packing of (w1,b1,w2,b2,w3,b3) into small zero-padded arrays.

    Weights are stored as (in_features, out_features) so the kernel computes x @ W.
    Hidden dims are padded to multiples of 8 sublanes; padding is exact (zeros).
    """
    w1, b1, w2, b2, w3, b3 = params
    in_f, h1 = w1.shape
    h2 = w2.shape[1]
    out = w3.shape[1]
    h1p = _round_up(h1, 8)
    h2p = _round_up(h2, 8)

    def pad2(a, rows, cols):
        z = jnp.zeros((rows, cols), compute_dtype)
        return z.at[:a.shape[0], :a.shape[1]].set(a.astype(compute_dtype))

    w1p = pad2(w1, in_f, h1p)                 # (4, 8)
    w2p = pad2(w2, h1p, h2p)                  # (8, 16)
    w3p = pad2(w3, h2p, out)                  # (16, 3)
    b1p = pad2(b1.reshape(1, -1), 1, h1p)     # (1, 8)
    b2p = pad2(b2.reshape(1, -1), 1, h2p)     # (1, 16)
    b3p = pad2(b3.reshape(1, -1), 1, out)     # (1, 3)
    return w1p, w2p, w3p, b1p, b2p, b3p


def mlp_forward(x, packed_params, *, tile_n=1024, out_dtype=jnp.float32):
    """Fused MLP forward.  x: (N, in_features); returns (N, out_dim) in out_dtype."""
    w1p, w2p, w3p, b1p, b2p, b3p = packed_params
    n, in_f = x.shape
    assert in_f == w1p.shape[0], "x feature dim must match packed w1"
    out_dim = w3p.shape[1]

    # Batch tiling granularity: 8 sublanes for 32-bit x, 16 for 16-bit x.
    gran = 16 if x.dtype.itemsize == 2 else 8
    tile_n = max(gran, min(tile_n, _round_up(n, gran)))
    tile_n = _round_up(tile_n, gran)

    n_pad = _round_up(n, tile_n)
    steps = n_pad // tile_n
    # Small grids: round to an even step count so v7x's two TensorCores split evenly.
    if 1 < steps <= 8 and steps % 2:
        steps += 1
        n_pad = steps * tile_n
    x_in = x if n_pad == n else jnp.pad(x, ((0, n_pad - n), (0, 0)))

    def param_spec(a):
        # Full-extent block + constant index map -> DMA'd once, VMEM-resident.
        return pl.BlockSpec(a.shape, lambda i: (0, 0))

    out = pl.pallas_call(
        mlp_kernel,
        out_shape=jax.ShapeDtypeStruct((n_pad, out_dim), out_dtype),
        grid_spec=pltpu.PrefetchScalarGridSpec(
            num_scalar_prefetch=0,
            grid=(steps,),
            in_specs=[
                # x: narrow (tile_n, in_f) block; last dim = full array extent.
                pl.BlockSpec((tile_n, in_f), lambda i: (i, 0)),
                param_spec(w1p), param_spec(w2p), param_spec(w3p),
                param_spec(b1p), param_spec(b2p), param_spec(b3p),
            ],
            # Output is exactly (N_pad, out_dim): no wide slab, no wrapper slice pass.
            out_specs=pl.BlockSpec((tile_n, out_dim), lambda i: (i, 0)),
        ),
        compiler_params=pltpu.CompilerParams(
            dimension_semantics=("parallel",)),
    )(x_in, w1p, w2p, w3p, b1p, b2p, b3p)

    return out if n_pad == n else out[:n]


def init_params(key, in_features=4, h1=8, h2=9, out=3):
    """Deterministic init mirroring nn.Linear shapes (weights stored as (in, out))."""
    ks = jax.random.split(key, 6)

    def linear(kw, kb, fan_in, fan_out):
        bound = 1.0 / jnp.sqrt(float(fan_in))  # nn.Linear default init range
        w = jax.random.uniform(kw, (fan_in, fan_out), jnp.float32, -bound, bound)
        b = jax.random.uniform(kb, (fan_out,), jnp.float32, -bound, bound)
        return w, b

    w1, b1 = linear(ks[0], ks[1], in_features, h1)
    w2, b2 = linear(ks[2], ks[3], h1, h2)
    w3, b3 = linear(ks[4], ks[5], h2, out)
    return w1, b1, w2, b2, w3, b3


def reference_forward(x, params):
    w1, b1, w2, b2, w3, b3 = params
    h = jax.nn.relu(x @ w1 + b1)
    h = jax.nn.relu(h @ w2 + b2)
    return jax.nn.relu(h @ w3 + b3)


if __name__ == "__main__":
    key = jax.random.PRNGKey(0)
    k_params, k_x, k_x2 = jax.random.split(key, 3)

    params = init_params(k_params, in_features=4, h1=8, h2=9, out=3)
    x = jax.random.normal(k_x, (8, 4), dtype=jnp.float32)  # batch=8, in_features=4

    y_ref = reference_forward(x, params)

    # f32 packing: exact agreement with the f32 reference.
    y32 = mlp_forward(x, pack_params(params, compute_dtype=jnp.float32))
    jax.block_until_ready(y32)
    assert y32.shape == (8, 3), y32.shape
    assert jnp.allclose(y32, y_ref, atol=1e-5, rtol=1e-5), "f32 mismatch vs. reference"

    # Default bf16 packing (MXU-native on v5e/v6e/v7x), f32 accumulation inside.
    y16 = mlp_forward(x, pack_params(params))
    jax.block_until_ready(y16)
    assert jnp.allclose(y16, y_ref, atol=5e-2, rtol=5e-2), "bf16 mismatch vs. reference"

    # Multi-step grid path: row padding + even step count for the v7x megacore split.
    x2 = jax.random.normal(k_x2, (48, 4), dtype=jnp.float32)
    y2 = mlp_forward(x2, pack_params(params, compute_dtype=jnp.float32), tile_n=16)
    jax.block_until_ready(y2)
    assert y2.shape == (48, 3), y2.shape
    assert jnp.allclose(y2, reference_forward(x2, params), atol=1e-5, rtol=1e-5), \
        "multi-tile mismatch vs. reference"

    print("KERNEL_OK")
</pallas_src>

<mosaic_0001>
module attributes {stable_mosaic.version = 11 : i64} {
  func.func @mlp_kernel(%arg0: i32, %arg1: memref<8x4xf32, #tpu.memory_space<vmem>>, %arg2: memref<4x8xf32, #tpu.memory_space<vmem>>, %arg3: memref<8x16xf32, #tpu.memory_space<vmem>>, %arg4: memref<16x3xf32, #tpu.memory_space<vmem>>, %arg5: memref<1x8xf32, #tpu.memory_space<vmem>>, %arg6: memref<1x16xf32, #tpu.memory_space<vmem>>, %arg7: memref<1x3xf32, #tpu.memory_space<vmem>>, %arg8: memref<8x3xf32, #tpu.memory_space<vmem>>) attributes {dimension_semantics = [#tpu.dimension_semantics<parallel>], iteration_bounds = array<i64: 1>, scalar_prefetch = 0 : i64, scratch_operands = 0 : i64, tpu.core_type = #tpu.core_type<tc>, window_params = [{transform_indices = @transform_0, window_bounds = array<i64: 8, 4>}, {pipeline_mode = #tpu.pipeline_mode<synchronous>, transform_indices = @transform_1, window_bounds = array<i64: 4, 8>}, {pipeline_mode = #tpu.pipeline_mode<synchronous>, transform_indices = @transform_2, window_bounds = array<i64: 8, 16>}, {pipeline_mode = #tpu.pipeline_mode<synchronous>, transform_indices = @transform_3, window_bounds = array<i64: 16, 3>}, {pipeline_mode = #tpu.pipeline_mode<synchronous>, transform_indices = @transform_4, window_bounds = array<i64: 1, 8>}, {pipeline_mode = #tpu.pipeline_mode<synchronous>, transform_indices = @transform_5, window_bounds = array<i64: 1, 16>}, {pipeline_mode = #tpu.pipeline_mode<synchronous>, transform_indices = @transform_6, window_bounds = array<i64: 1, 3>}, {transform_indices = @transform_7, window_bounds = array<i64: 8, 3>}]} {
    %c0 = arith.constant 0 : index
    %c0_0 = arith.constant 0 : index
    %0 = vector.load %arg2[%c0, %c0_0] : memref<4x8xf32, #tpu.memory_space<vmem>>, vector<4x8xf32>
    %c0_1 = arith.constant 0 : index
    %c0_2 = arith.constant 0 : index
    %1 = vector.load %arg3[%c0_1, %c0_2] : memref<8x16xf32, #tpu.memory_space<vmem>>, vector<8x16xf32>
    %c0_3 = arith.constant 0 : index
    %c0_4 = arith.constant 0 : index
    %2 = vector.load %arg4[%c0_3, %c0_4] : memref<16x3xf32, #tpu.memory_space<vmem>>, vector<16x3xf32>
    %c0_5 = arith.constant 0 : index
    %c0_6 = arith.constant 0 : index
    %3 = vector.load %arg1[%c0_5, %c0_6] : memref<8x4xf32, #tpu.memory_space<vmem>>, vector<8x4xf32>
    %cst = arith.constant dense<0.000000e+00> : vector<8x8xf32>
    %4 = tpu.matmul %3, %0, %cst {dimension_numbers = #tpu.dot_dimension_numbers<[1], [0], [0], [1], [0, 0, 1, 1], [], []>} : vector<8x4xf32>, vector<4x8xf32>, vector<8x8xf32> -> vector<8x8xf32>
    %c0_7 = arith.constant 0 : index
    %c0_8 = arith.constant 0 : index
    %5 = vector.load %arg5[%c0_7, %c0_8] : memref<1x8xf32, #tpu.memory_space<vmem>>, vector<1x8xf32>
    %6 = vector.broadcast %5 : vector<1x8xf32> to vector<8x8xf32>
    %7 = arith.addf %4, %6 : vector<8x8xf32>
    %cst_9 = arith.constant 0.000000e+00 : f32
    %8 = vector.broadcast %cst_9 : f32 to vector<8x8xf32>
    %9 = arith.maximumf %7, %8 : vector<8x8xf32>
    %cst_10 = arith.constant dense<0.000000e+00> : vector<8x16xf32>
    %10 = tpu.matmul %9, %1, %cst_10 {dimension_numbers = #tpu.dot_dimension_numbers<[1], [0], [0], [1], [0, 0, 1, 1], [], []>} : vector<8x8xf32>, vector<8x16xf32>, vector<8x16xf32> -> vector<8x16xf32>
    %c0_11 = arith.constant 0 : index
    %c0_12 = arith.constant 0 : index
    %11 = vector.load %arg6[%c0_11, %c0_12] : memref<1x16xf32, #tpu.memory_space<vmem>>, vector<1x16xf32>
    %12 = vector.broadcast %11 : vector<1x16xf32> to vector<8x16xf32>
    %13 = arith.addf %10, %12 : vector<8x16xf32>
    %cst_13 = arith.constant 0.000000e+00 : f32
    %14 = vector.broadcast %cst_13 : f32 to vector<8x16xf32>
    %15 = arith.maximumf %13, %14 : vector<8x16xf32>
    %cst_14 = arith.constant dense<0.000000e+00> : vector<8x3xf32>
    %16 = tpu.matmul %15, %2, %cst_14 {dimension_numbers = #tpu.dot_dimension_numbers<[1], [0], [0], [1], [0, 0, 1, 1], [], []>} : vector<8x16xf32>, vector<16x3xf32>, vector<8x3xf32> -> vector<8x3xf32>
    %c0_15 = arith.constant 0 : index
    %c0_16 = arith.constant 0 : index
    %17 = vector.load %arg7[%c0_15, %c0_16] : memref<1x3xf32, #tpu.memory_space<vmem>>, vector<1x3xf32>
    %18 = vector.broadcast %17 : vector<1x3xf32> to vector<8x3xf32>
    %19 = arith.addf %16, %18 : vector<8x3xf32>
    %cst_17 = arith.constant 0.000000e+00 : f32
    %20 = vector.broadcast %cst_17 : f32 to vector<8x3xf32>
    %21 = arith.maximumf %19, %20 : vector<8x3xf32>
    %c0_18 = arith.constant 0 : index
    %c0_19 = arith.constant 0 : index
    %22 = vector.load %arg8[%c0_18, %c0_19] : memref<8x3xf32, #tpu.memory_space<vmem>>, vector<8x3xf32>
    tpu.vector_store %arg8[%c0_18, %c0_19], %21 {strides = array<i32>} : memref<8x3xf32, #tpu.memory_space<vmem>>, vector<8x3xf32>,
    return
  }
  func.func @transform_0(%arg0: i32) -> (i32, i32) {
    %c0_i32 = arith.constant 0 : i32
    %c0_i32_0 = arith.constant 0 : i32
    return %arg0, %c0_i32 : i32, i32
  }
  func.func @transform_1(%arg0: i32) -> (i32, i32) {
    %c0_i32 = arith.constant 0 : i32
    %c0_i32_0 = arith.constant 0 : i32
    %c0_i32_1 = arith.constant 0 : i32
    return %c0_i32, %c0_i32_0 : i32, i32
  }
  func.func @transform_2(%arg0: i32) -> (i32, i32) {
    %c0_i32 = arith.constant 0 : i32
    %c0_i32_0 = arith.constant 0 : i32
    %c0_i32_1 = arith.constant 0 : i32
    return %c0_i32, %c0_i32_0 : i32, i32
  }
  func.func @transform_3(%arg0: i32) -> (i32, i32) {
    %c0_i32 = arith.constant 0 : i32
    %c0_i32_0 = arith.constant 0 : i32
    %c0_i32_1 = arith.constant 0 : i32
    return %c0_i32, %c0_i32_0 : i32, i32
  }
  func.func @transform_4(%arg0: i32) -> (i32, i32) {
    %c0_i32 = arith.constant 0 : i32
    %c0_i32_0 = arith.constant 0 : i32
    %c0_i32_1 = arith.constant 0 : i32
    return %c0_i32, %c0_i32_0 : i32, i32
  }
  func.func @transform_5(%arg0: i32) -> (i32, i32) {
    %c0_i32 = arith.constant 0 : i32
    %c0_i32_0 = arith.constant 0 : i32
    %c0_i32_1 = arith.constant 0 : i32
    return %c0_i32, %c0_i32_0 : i32, i32
  }
  func.func @transform_6(%arg0: i32) -> (i32, i32) {
    %c0_i32 = arith.constant 0 : i32
    %c0_i32_0 = arith.constant 0 : i32
    %c0_i32_1 = arith.constant 0 : i32
    return %c0_i32, %c0_i32_0 : i32, i32
  }
  func.func @transform_7(%arg0: i32) -> (i32, i32) {
    %c0_i32 = arith.constant 0 : i32
    %c0_i32_0 = arith.constant 0 : i32
    return %arg0, %c0_i32 : i32, i32
  }
}

</mosaic_0001>

<bundles_post_ra>
// kernel: tpu_custom_call.1
= control target key start
LH: loop header
LB: loop body
LE: loop exit
PB: predicated region body
PF: predicated region fallthrough
CT: control target
= control target key end

     0   :  { %vm39_vm0 = vcmask 1043456   ;;  %vm35_vm1 = vcmask 31744   ;;  %vm68_vm2 = vcmask 64512   ;;  %vm97_vm3 = vcmask 130048   ;;  %s202_s1 = inlined_call_operand.vmem [shape: f32[4,8], index: 1, kind: input, shape index: {}]   ;;  %s203_s0 = inlined_call_operand.vmem [shape: f32[8,4], index: 0, kind: input, shape index: {}]   ;;  %s204_s4 = inlined_call_operand.vmem [shape: f32[1,8], index: 4, kind: input, shape index: {}]   ;;  %s205_s5 = inlined_call_operand.vmem [shape: f32[1,16], index: 5, kind: input, shape index: {}]   ;;  %s206_s2 = inlined_call_operand.vmem [shape: f32[8,16], index: 2, kind: input, shape index: {}]   ;;  %s207_s6 = inlined_call_operand.vmem [shape: f32[1,3], index: 6, kind: input, shape index: {}]   ;;  %s208_s3 = inlined_call_operand.vmem [shape: f32[16,3], index: 3, kind: input, shape index: {}]   ;;  %s209_s7 = inlined_call_operand.vmem [shape: f32[8,3], index: 7, kind: output, shape index: {}]  }
   0x1   :  { %v26_v0 = vld [vmem:[%s202_s1] sm:$0xf]  ;;  %v29_v7 = vld [vmem:[%s208_s3 + $0x8] sm:$0xff]  ;;  %vm122_vm4 = vcmask 23552  }
   0x2   :  { %v30_v1 = vld [vmem:[%s203_s0] sm:$0xff]  ;;  %128 = vmatpush.msk.msra.mxu0 %vm39_vm0, %v26_v0  ;;  %115 = vmatpush.msra.mxu2 %v29_v7 }
   0x3   :  { %129 = vmatmul.msk.f32.vlgmr.msra.gmra.mxu0 %vm35_vm1, %v30_v1  ;;  %v27_v2 = vld [vmem:[%s206_s2] sm:$0xff] }
   0x4   :  { %87 = vmatpush.msra.mxu1 %v27_v2  ;;  %v132_v3 = vld [vmem:[%s204_s4] ss:$0 sm:$0xff] }
   0x5   :  { %v28_v8 = vld [vmem:[%s208_s3] sm:$0xff] }
   0x6   :  { %116 = vmatpush.msra.mxu2 %v28_v8  ;;  %v133_v9 = vld [vmem:[%s205_s5] ss:$0 sm:$0xff] }
   0x7   :  { %v134_v13 = vld [vmem:[%s207_s6] ss:$0 sm:$0xff] }
  0x80   :  { %v60_v4 = vpop.f32.mrf.mxu0 }
  0x81   :  { %v61_v5 = vadd.f32 %v132_v3, %v60_v4 }
  0x83   :  { %v63_v6 = vmax.f32 %v61_v5, 0.0 }
  0x85   :  { %130 = vmatmul.msk.f32.vlgmr.msra.gmra.mxu1 %vm68_vm2, %v63_v6 }
 0x102   :  { %v89_v10 = vpop.f32.mrf.mxu1 }
 0x103   :  { %v90_v11 = vadd.f32 %v133_v9, %v89_v10 }
 0x105   :  { %v92_v12 = vmax.f32 %v90_v11, 0.0 }
 0x107   :  { %131 = vmatmul.msk.f32.vlgmr.msra.gmra.mxu2 %vm97_vm3, %v92_v12 }
 0x18a   :  { %v118_v14 = vpop.f32.mrf.mxu2 }
 0x18b   :  { %v119_v15 = vadd.f32 %v134_v13, %v118_v14 }
 0x18d   :  { %v121_v16 = vmax.f32 %v119_v15, 0.0 }
 0x18f   :  { %123 = vst.msk [vmem:[%s209_s7] sm:$0xff] %vm122_vm4, %v121_v16 }

</bundles_post_ra>
